<compile_context>
chip_gen: v6e
topology: v6e:2x2x1
jax: 0.10.0
libtpu: 0.0.40
codegen_flags: <defaults>
</compile_context>

<pallas_src>
import functools

import jax
import jax.numpy as jnp
from jax.experimental import pallas as pl
from jax.experimental.pallas import tpu as pltpu


# ----------------------------------------------------------------------------
# Kernel A: probability mask + rescale + stochastic binarization, (B, W) sized
# ----------------------------------------------------------------------------
def _prob_mask_kernel(sampler_ref, mask_ref, u_ref, newmask_ref, prob_ref,
                      *, slope, budget):
    s = sampler_ref[...]                      # (1, W) parameter
    m = mask_ref[...]                         # (B, W) 0/1 float mask
    u = u_ref[...]                            # (B, W) uniforms in [0, 1)

    # F.softplus(x, beta=slope) = log(1 + exp(slope*x)) / slope, linear when
    # slope*x > 20 (PyTorch threshold).  Clamp the exp argument so the
    # discarded branch cannot overflow.
    z = slope * s
    sp = jnp.where(z > 20.0, s, jnp.log1p(jnp.exp(jnp.minimum(z, 20.0))) / slope)
    prob = jnp.broadcast_to(sp, m.shape)      # expand(B, W)

    one_minus_m = 1.0 - m
    denom = jnp.max(one_minus_m * prob, axis=1, keepdims=True)
    prob = prob / jnp.maximum(denom, 1e-30)   # guard against all-acquired rows
    masked_prob = prob * one_minus_m

    # rescale_probs over the unmasked (mask == 0) columns only.
    k = jnp.sum(one_minus_m, axis=1, keepdims=True)      # #zeros per row
    k_safe = jnp.maximum(k, 1.0)
    sparsity = budget / k_safe
    xbar = jnp.sum(masked_prob, axis=1, keepdims=True) / k_safe
    r = sparsity / jnp.maximum(xbar, 1e-30)
    beta = (1.0 - sparsity) / jnp.maximum(1.0 - xbar, 1e-30)
    rescaled = jnp.where(r <= 1.0, masked_prob * r,
                         1.0 - (1.0 - masked_prob) * beta)
    masked_prob = jnp.where(m == 0.0, rescaled, 0.0)     # scatter-back semantics

    # ThresholdSigmoidMask.forward: stochastic binarization (x > U[0,1)).
    # TODO(synk): the rejection-sampling retry loop (resample until
    # mean(result) ~= mean(x)) has no clean Pallas equivalent; one draw is used.
    bin_mask = (masked_prob > u).astype(jnp.float32)

    newmask_ref[...] = m + bin_mask           # mask + acquisitions
    prob_ref[...] = masked_prob               # final_prob_mask (flat)


# ----------------------------------------------------------------------------
# Kernel B: elementwise masking of kspace (memory-bound hot path)
# ----------------------------------------------------------------------------
def _mask_kspace_kernel(mask_ref, k_ref, out_ref):
    m = mask_ref[...]                         # (1, 1, W*C) column mask ({0,1})
    k = k_ref[...]                            # (1, TR, W*C) kspace tile
    # mask*kspace followed by the fix_sign_leakage correction collapses to a
    # single select for a {0,1} mask: acquired columns keep kspace, the rest
    # become exactly zero (matching the reference forward output).
    out_ref[...] = jnp.where(m != 0.0, k, jnp.zeros_like(k))


def _row_tile(mh, wc, itemsize):
    """Row-tile size: keep the 4 double-buffered kspace tiles under ~24 MiB."""
    budget = 24 * 1024 * 1024
    max_rows = max(8, budget // (4 * wc * itemsize))
    if mh <= max_rows:
        return mh                             # whole axis fits: single block
    tr = min(2048, max_rows)
    return max(8, (tr // 8) * 8)              # keep the (8, 128) sublane rule


def loupe_policy_forward(mask, kspace, sampler, key, *, budget, slope=10.0):
    B, M, H, W, C = kspace.shape
    mask_flat = mask.astype(jnp.float32).reshape(B, W)
    sampler = sampler.astype(jnp.float32)
    uniforms = jax.random.uniform(key, (B, W), dtype=jnp.float32)

    # --- kernel A: probability mask, rescale, stochastic binarization -------
    kern_a = functools.partial(_prob_mask_kernel, slope=float(slope),
                               budget=float(budget))
    new_mask_flat, prob_flat = pl.pallas_call(
        kern_a,
        out_shape=[jax.ShapeDtypeStruct((B, W), jnp.float32)] * 2,
    )(sampler, mask_flat, uniforms)

    # --- kernel B: masking in native layout (no transposes) -----------------
    MH, WC = M * H, W * C
    kspace_r = kspace.reshape(B, MH, WC)                  # contiguous, free
    mask_wc = jnp.repeat(new_mask_flat, C, axis=1).reshape(B, 1, WC)

    TR = _row_tile(MH, WC, jnp.dtype(kspace.dtype).itemsize)
    masked_r = pl.pallas_call(
        _mask_kspace_kernel,
        out_shape=jax.ShapeDtypeStruct((B, MH, WC), kspace.dtype),
        grid=(B, pl.cdiv(MH, TR)),
        in_specs=[pl.BlockSpec((1, 1, WC), lambda b, r: (b, 0, 0)),   # resident
                  pl.BlockSpec((1, TR, WC), lambda b, r: (b, r, 0))],
        out_specs=pl.BlockSpec((1, TR, WC), lambda b, r: (b, r, 0)),
        compiler_params=pltpu.CompilerParams(
            dimension_semantics=("parallel", "parallel"),
            vmem_limit_bytes=32 * 1024 * 1024),
    )(mask_wc, kspace_r)
    masked_kspace = masked_r.reshape(B, M, H, W, C)

    new_mask = new_mask_flat.reshape(B, 1, 1, W, 1)
    final_prob_mask = prob_flat.reshape(B, 1, 1, W, 1)
    return new_mask, masked_kspace, final_prob_mask


if __name__ == "__main__":
    key = jax.random.PRNGKey(0)
    k1, k2, k3 = jax.random.split(key, 3)

    B, M, H, W, C = 2, 1, 16, 16, 2   # num_actions = W = 16
    budget = 4

    # Parameter init (use_softplus=True): Normal(mean=1, std=0.1), shape (1, W)
    sampler = 1.0 + 0.1 * jax.random.normal(k1, (1, W), dtype=jnp.float32)

    # Input mask: first 4 columns already acquired (equal zero-count per batch
    # element, as required by the reference `.reshape(B, -1)`).
    mask_cols = (jnp.arange(W) < 4).astype(jnp.float32)
    mask = jnp.broadcast_to(mask_cols.reshape(1, 1, 1, W, 1), (B, 1, 1, W, 1))

    kspace = jax.random.normal(k2, (B, M, H, W, C), dtype=jnp.float32)

    new_mask, masked_kspace, final_prob_mask = loupe_policy_forward(
        mask, kspace, sampler, k3, budget=budget, slope=10.0)
    jax.block_until_ready((new_mask, masked_kspace, final_prob_mask))

    assert new_mask.shape == (B, 1, 1, W, 1)
    assert masked_kspace.shape == (B, M, H, W, C)
    assert final_prob_mask.shape == (B, 1, 1, W, 1)
    print("KERNEL_OK")
</pallas_src>

<mosaic_0001>
module attributes {stable_mosaic.version = 11 : i64} {
  func.func @_prob_mask_kernel(%arg0: memref<1x16xf32, #tpu.memory_space<vmem>>, %arg1: memref<2x16xf32, #tpu.memory_space<vmem>>, %arg2: memref<2x16xf32, #tpu.memory_space<vmem>>, %arg3: memref<2x16xf32, #tpu.memory_space<vmem>>, %arg4: memref<2x16xf32, #tpu.memory_space<vmem>>) attributes {dimension_semantics = [], scalar_prefetch = 0 : i64, scratch_operands = 0 : i64, tpu.core_type = #tpu.core_type<tc>} {
    %c0 = arith.constant 0 : index
    %c0_0 = arith.constant 0 : index
    %0 = vector.load %arg0[%c0, %c0_0] : memref<1x16xf32, #tpu.memory_space<vmem>>, vector<1x16xf32>
    %c0_1 = arith.constant 0 : index
    %c0_2 = arith.constant 0 : index
    %1 = vector.load %arg1[%c0_1, %c0_2] : memref<2x16xf32, #tpu.memory_space<vmem>>, vector<2x16xf32>
    %c0_3 = arith.constant 0 : index
    %c0_4 = arith.constant 0 : index
    %2 = vector.load %arg2[%c0_3, %c0_4] : memref<2x16xf32, #tpu.memory_space<vmem>>, vector<2x16xf32>
    %cst = arith.constant 1.000000e+01 : f32
    %3 = vector.broadcast %cst : f32 to vector<1x16xf32>
    %4 = arith.mulf %3, %0 : vector<1x16xf32>
    %cst_5 = arith.constant 2.000000e+01 : f32
    %5 = vector.broadcast %cst_5 : f32 to vector<1x16xf32>
    %6 = arith.cmpf ogt, %4, %5 : vector<1x16xf32>
    %cst_6 = arith.constant 2.000000e+01 : f32
    %7 = vector.broadcast %cst_6 : f32 to vector<1x16xf32>
    %8 = arith.minimumf %4, %7 : vector<1x16xf32>
    %9 = math.exp %8 : vector<1x16xf32>
    %10 = math.log1p %9 : vector<1x16xf32>
    %cst_7 = arith.constant 1.000000e+01 : f32
    %11 = vector.broadcast %cst_7 : f32 to vector<1x16xf32>
    %12 = arith.divf %10, %11 : vector<1x16xf32>
    %13 = arith.select %6, %0, %12 : vector<1x16xi1>, vector<1x16xf32>
    %14 = vector.shape_cast %13 : vector<1x16xf32> to vector<1x16xf32>
    %15 = vector.broadcast %14 : vector<1x16xf32> to vector<2x16xf32>
    %cst_8 = arith.constant 1.000000e+00 : f32
    %16 = vector.broadcast %cst_8 : f32 to vector<2x16xf32>
    %17 = arith.subf %16, %1 : vector<2x16xf32>
    %18 = arith.mulf %17, %15 : vector<2x16xf32>
    %cst_9 = arith.constant dense<0xFF800000> : vector<2xf32>
    %19 = vector.multi_reduction <maximumf>, %18, %cst_9 [1] : vector<2x16xf32> to vector<2xf32>
    %20 = vector.shape_cast %19 : vector<2xf32> to vector<2x1xf32>
    %cst_10 = arith.constant 1.000000e-30 : f32
    %21 = vector.broadcast %cst_10 : f32 to vector<2x1xf32>
    %22 = arith.maximumf %20, %21 : vector<2x1xf32>
    %23 = vector.broadcast %22 : vector<2x1xf32> to vector<2x16xf32>
    %24 = arith.divf %15, %23 : vector<2x16xf32>
    %25 = arith.mulf %24, %17 : vector<2x16xf32>
    %cst_11 = arith.constant dense<0.000000e+00> : vector<2xf32>
    %26 = vector.multi_reduction <add>, %17, %cst_11 [1] : vector<2x16xf32> to vector<2xf32>
    %27 = vector.shape_cast %26 : vector<2xf32> to vector<2x1xf32>
    %cst_12 = arith.constant 1.000000e+00 : f32
    %28 = vector.broadcast %cst_12 : f32 to vector<2x1xf32>
    %29 = arith.maximumf %27, %28 : vector<2x1xf32>
    %cst_13 = arith.constant 4.000000e+00 : f32
    %30 = vector.broadcast %cst_13 : f32 to vector<2x1xf32>
    %31 = arith.divf %30, %29 : vector<2x1xf32>
    %cst_14 = arith.constant dense<0.000000e+00> : vector<2xf32>
    %32 = vector.multi_reduction <add>, %25, %cst_14 [1] : vector<2x16xf32> to vector<2xf32>
    %33 = vector.shape_cast %32 : vector<2xf32> to vector<2x1xf32>
    %34 = arith.divf %33, %29 : vector<2x1xf32>
    %cst_15 = arith.constant 1.000000e-30 : f32
    %35 = vector.broadcast %cst_15 : f32 to vector<2x1xf32>
    %36 = arith.maximumf %34, %35 : vector<2x1xf32>
    %37 = arith.divf %31, %36 : vector<2x1xf32>
    %cst_16 = arith.constant 1.000000e+00 : f32
    %38 = vector.broadcast %cst_16 : f32 to vector<2x1xf32>
    %39 = arith.subf %38, %31 : vector<2x1xf32>
    %cst_17 = arith.constant 1.000000e+00 : f32
    %40 = vector.broadcast %cst_17 : f32 to vector<2x1xf32>
    %41 = arith.subf %40, %34 : vector<2x1xf32>
    %cst_18 = arith.constant 1.000000e-30 : f32
    %42 = vector.broadcast %cst_18 : f32 to vector<2x1xf32>
    %43 = arith.maximumf %41, %42 : vector<2x1xf32>
    %44 = arith.divf %39, %43 : vector<2x1xf32>
    %cst_19 = arith.constant 1.000000e+00 : f32
    %45 = vector.broadcast %cst_19 : f32 to vector<2x1xf32>
    %46 = arith.cmpf ole, %37, %45 : vector<2x1xf32>
    %47 = vector.broadcast %37 : vector<2x1xf32> to vector<2x16xf32>
    %48 = arith.mulf %25, %47 : vector<2x16xf32>
    %cst_20 = arith.constant 1.000000e+00 : f32
    %49 = vector.broadcast %cst_20 : f32 to vector<2x16xf32>
    %50 = arith.subf %49, %25 : vector<2x16xf32>
    %51 = vector.broadcast %44 : vector<2x1xf32> to vector<2x16xf32>
    %52 = arith.mulf %50, %51 : vector<2x16xf32>
    %cst_21 = arith.constant 1.000000e+00 : f32
    %53 = vector.broadcast %cst_21 : f32 to vector<2x16xf32>
    %54 = arith.subf %53, %52 : vector<2x16xf32>
    %55 = vector.shape_cast %46 : vector<2x1xi1> to vector<2x1xi1>
    %56 = vector.broadcast %55 : vector<2x1xi1> to vector<2x16xi1>
    %57 = arith.select %56, %48, %54 : vector<2x16xi1>, vector<2x16xf32>
    %cst_22 = arith.constant 0.000000e+00 : f32
    %58 = vector.broadcast %cst_22 : f32 to vector<2x16xf32>
    %59 = arith.cmpf oeq, %1, %58 : vector<2x16xf32>
    %cst_23 = arith.constant 0.000000e+00 : f32
    %60 = vector.broadcast %cst_23 : f32 to vector<2x16xf32>
    %61 = arith.select %59, %57, %60 : vector<2x16xi1>, vector<2x16xf32>
    %62 = arith.cmpf ogt, %61, %2 : vector<2x16xf32>
    %63 = arith.extui %62 : vector<2x16xi1> to vector<2x16xi32>
    %64 = arith.sitofp %63 : vector<2x16xi32> to vector<2x16xf32>
    %65 = arith.addf %1, %64 : vector<2x16xf32>
    %c0_24 = arith.constant 0 : index
    %c0_25 = arith.constant 0 : index
    %66 = vector.load %arg3[%c0_24, %c0_25] : memref<2x16xf32, #tpu.memory_space<vmem>>, vector<2x16xf32>
    tpu.vector_store %arg3[%c0_24, %c0_25], %65 {strides = array<i32>} : memref<2x16xf32, #tpu.memory_space<vmem>>, vector<2x16xf32>,
    %c0_26 = arith.constant 0 : index
    %c0_27 = arith.constant 0 : index
    %67 = vector.load %arg4[%c0_26, %c0_27] : memref<2x16xf32, #tpu.memory_space<vmem>>, vector<2x16xf32>
    tpu.vector_store %arg4[%c0_26, %c0_27], %61 {strides = array<i32>} : memref<2x16xf32, #tpu.memory_space<vmem>>, vector<2x16xf32>,
    return
  }
}

</mosaic_0001>

<bundles_post_ra>
// kernel: tpu_custom_call.1
= control target key start
LH: loop header
LB: loop body
LE: loop exit
PB: predicated region body
PF: predicated region fallthrough
CT: control target
= control target key end

     0   :  { %10 = vsyncpa [#allocation3], 0  ;;  %s303_s0 = inlined_call_operand.hbm [shape: f32[1,16], index: 0, kind: input, shape index: {}]   ;;  %s304_s1 = inlined_call_operand.hbm [shape: f32[2,16], index: 1, kind: input, shape index: {}]   ;;  %s305_s2 = inlined_call_operand.vmem [shape: f32[2,16], index: 2, kind: input, shape index: {}]   ;;  %s306_s3 = inlined_call_operand.hbm [shape: f32[2,16], index: 3, kind: output, shape index: {0}]   ;;  %s307_s4 = inlined_call_operand.hbm [shape: f32[2,16], index: 4, kind: output, shape index: {1}]  }
   0x1   :  { %11 = vsyncpa [#allocation6], 0 }
   0x2   :  { %12 = vsyncpa [#allocation4], 0 }
   0x3   :  { %13 = vsyncpa [#allocation9], 0  ;;  %s248_s15 = smov [#allocation2]   ;;  %s249_s17 = smov [#allocation5]  }
   0x4   :  { %s20_s16 = sshll.u32 %s248_s15, 4  ;;  %s30_s18 = sshll.u32 %s249_s17, 4  ;;  %s21_s16 = int_to_ptr.vmem [resolvable:$true] %s20_s16  ;;  %s31_s18 = int_to_ptr.vmem [resolvable:$true] %s30_s18 }
   0x5   :  { %s168_s19 = scalar_lea.vmem %s21_s16, 16  ;;  %s172_s20 = scalar_lea.vmem %s21_s16, 32 }
   0x6   :  { %p169_p0 = scmp.ne.s32.totalorder %s21_s16, %s168_s19  ;;  %p173_p1 = scmp.lt.s32.totalorder %s21_s16, %s21_s16 }
   0x7   :  { %p174_p2 = scmp.lt.s32.totalorder %s172_s20, %s168_s19 }
   0x9   :  { %p175_p3 = por %p174_p2, %p173_p1 }
   0xb   :  { %p176_p4 = pnand %p175_p3, %p169_p0 }
   0xd   :  { %179 = shalt.err (!%p176_p4)
}
   0xe   :  { %23 = dma.hbm_to_vmem [thread:$0]  %s303_s0, 16, %s21_s16, [#allocation3]  }
   0xf   :  { %s188_s23 = scalar_lea.vmem %s31_s18, 32  ;;  %p193_p6 = scmp.lt.s32.totalorder %s31_s18, %s31_s18 }
  0x10   :  { %p189_p5 = scmp.ne.s32.totalorder %s31_s18, %s188_s23  ;;  %p194_p7 = scmp.lt.s32.totalorder %s188_s23, %s188_s23 }
  0x12   :  { %p195_p8 = por %p194_p7, %p193_p6 }
  0x14   :  { %p196_p9 = pnand %p195_p8, %p189_p5 }
  0x16   :  { %199 = shalt.err (!%p196_p9)
}
  0x17   :  { %33 = dma.hbm_to_vmem [thread:$0]  %s304_s1, 32, %s31_s18, [#allocation6]  }
  0x18   :  { %240 = dma.done.wait [#allocation3], 16  }
  0x19   :  { %241 = vsyncadd [#allocation3], 4294967280 }
  0x1a   :  { %242 = dma.done.wait [#allocation6], 32  }
  0x1b   :  { %243 = vsyncadd [#allocation6], 4294967264  ;;  %v42_v0 = vld [vmem:[#allocation2] sm:$0x1]  ;;  %v63_v8 = vlaneseq  ;;  %v284_v14 = vld [vmem:[#allocation5] sm:$0x3] }
  0x1c   :  { %v45_v1 = vmul.f32 10.0, %v42_v0  ;;  %v68_v18 = vsub.f32 1.0, %v284_v14  ;;  %vm70_vm2 = vcmask 123904   ;;  %s250_s0 = smov [#allocation8]   ;;  %vm104_vm3 = vcmp.eq.f32.partialorder %v284_v14, 0.0  ;;  %s251_s28 = smov [#allocation7]  }
  0x1d   :  { %v64_v11 = vshrl.u32 %v63_v8, 7  ;;  %s128_s1 = sshll.u32 %s250_s0, 4  ;;  %v44_v48 = vld [vmem:[%s305_s2] sm:$0x3]  ;;  %s118_s29 = sshll.u32 %s251_s28, 4  ;;  %v252_v51 = vmov 0.0   ;;  %s129_s1 = int_to_ptr.vmem [resolvable:$true] %s128_s1  ;;  %s119_s29 = int_to_ptr.vmem [resolvable:$true] %s118_s29 }
  0x1e   :  { %v47_v2 = vmin.f32 %v45_v1, 20.0  ;;  %vm46_vm1 = vcmp.gt.f32.partialorder %v45_v1, 20.0  ;;  %v78_v23 = vsel %vm70_vm2, %v68_v18, 0.0  ;;  %s200_s30 = scalar_lea.vmem %s129_s1, 32  ;;  %p205_p11 = scmp.lt.s32.totalorder %s129_s1, %s129_s1 }
  0x1f   :  { %v65_v16 = vsub.s32 0, %v64_v11  ;;  %p201_p10 = scmp.ne.s32.totalorder %s129_s1, %s200_s30  ;;  %p206_p12 = scmp.lt.s32.totalorder %s200_s30, %s200_s30 }
  0x20   :  { %v48_v3 = vmul.f32 1.442695, %v47_v2 }
  0x21   :  { %p207_p13 = por %p206_p12, %p205_p11 }
  0x22   :  { %148 = vpow2.f32 %v48_v3 }
  0x23   :  { %p208_p0 = pnand %p207_p13, %p201_p10 }
  0x2f   :  { %v149_v4 = vpop.eup %148 }
  0x30   :  { %v50_v5 = vadd.f32 1.0, %v149_v4  ;;  %v53_v6 = vmul.f32 -0.5, %v149_v4  ;;  %v56_v9 = vand.u32 2147483647, %v149_v4 }
  0x32   :  { %150 = vlog2.f32 %v50_v5  ;;  %v54_v7 = vadd.f32 1.0, %v53_v6  ;;  %vm57_vm0 = vcmp.lt.f32.partialorder %v56_v9, 0.0004427343 }
  0x34   :  { %v55_v10 = vmul.f32 %v149_v4, %v54_v7 }
  0x3f   :  { %v151_v12 = vpop.eup %150 }
  0x40   :  { %v52_v13 = vmul.f32 0.6931472, %v151_v12 }
  0x42   :  { %v58_v15 = vsel %vm57_vm0, %v55_v10, %v52_v13 }
  0x43   :  { %v60_v17 = vmul.f32 0.1, %v58_v15 }
  0x45   :  { %v61_v19 = vsel %vm46_vm1, %v42_v0, %v60_v17 }
  0x46   :  { %v66_v20 = vrot.slane %v61_v19, %v65_v16 }
  0x48   :  { %v69_v21 = vmul.f32 %v68_v18, %v66_v20 }
  0x4a   :  { %v71_v22 = vsel %vm70_vm2, %v69_v21, -inf }
  0x4b   :  { %72 = vmax.xlane.f32.xlu0 %v71_v22 }
  0x4f   :  { %79 = vadd.xlane.f32.xlu0 %v78_v23 }
  0xd4   :  { %v73_v24 = vpop.xlane.xlu0 %72 }
  0xd5   :  { %v74_v25 = vmax.f32 %v73_v24, 1e-30 }
  0xd7   :  { %152 = vrcp.f32 %v74_v25 }
  0xd8   :  { %v80_v30 = vpop.xlane.xlu0 %79 }
  0xd9   :  { %v81_v31 = vmax.f32 %v80_v30, 1.0 }
  0xdb   :  { %154 = vrcp.f32 %v81_v31 }
  0xe4   :  { %v153_v26 = vpop.eup %152 }
  0xe5   :  { %v76_v27 = vmul.f32 %v153_v26, %v66_v20 }
  0xe7   :  { %v77_v28 = vmul.f32 %v76_v27, %v68_v18 }
  0xe8   :  { %v155_v32 = vpop.eup %154 }
  0xe9   :  { %v84_v29 = vsel %vm70_vm2, %v77_v28, 0.0  ;;  %v83_v38 = vmul.f32 4.0, %v155_v32  ;;  %v98_v42 = vsub.f32 1.0, %v77_v28 }
  0xea   :  { %85 = vadd.xlane.f32.xlu1 %v84_v29 }
  0xeb   :  { %v91_v40 = vsub.f32 1.0, %v83_v38 }
 0x173   :  { %v86_v33 = vpop.xlane.xlu1 %85 }
 0x174   :  { %v87_v34 = vmul.f32 %v155_v32, %v86_v33 }
 0x176   :  { %v88_v35 = vmax.f32 %v87_v34, 1e-30  ;;  %v92_v36 = vsub.f32 1.0, %v87_v34 }
 0x178   :  { %156 = vrcp.f32 %v88_v35  ;;  %v93_v37 = vmax.f32 %v92_v36, 1e-30 }
 0x17a   :  { %158 = vrcp.f32 %v93_v37 }
 0x185   :  { %v157_v39 = vpop.eup %156 }
 0x186   :  { %v90_v43 = vmul.f32 %v157_v39, %v83_v38 }
 0x187   :  { %v159_v41 = vpop.eup %158 }
 0x188   :  { %v95_v44 = vmul.f32 %v159_v41, %v91_v40  ;;  %v97_v46 = vmul.f32 %v90_v43, %v77_v28  ;;  %vm96_vm4 = vcmp.le.f32.partialorder %v90_v43, 1.0 }
 0x18a   :  { %v99_v45 = vmul.f32 %v98_v42, %v95_v44 }
 0x18c   :  { %v100_v47 = vsub.f32 1.0, %v99_v45 }
 0x18e   :  { %v103_v49 = vsel %vm96_vm4, %v97_v46, %v100_v47 }
 0x18f   :  { %v105_v50 = vsel %vm104_vm3, %v103_v49, 0.0 }
 0x190   :  { %vm106_vm5 = vcmp.gt.f32.partialorder %v105_v50, %v44_v48  ;;  %111 = vst.msk [vmem:[#allocation8] sm:$0x3] %vm70_vm2, %v105_v50 }
 0x191   :  { %v142_v52 = vsel %vm106_vm5, 1.0, %v252_v51 }
 0x192   :  { %211 = shalt.err (!%p208_p0)
}
 0x193   :  { %131 = dma.vmem_to_hbm [thread:$0]  %s129_s1, 32, %s307_s4, [#allocation9]   ;;  %v109_v53 = vadd.f32 %v142_v52, %v284_v14 }
 0x194   :  { %s220_s6 = scalar_lea.vmem %s119_s29, 32  ;;  %p225_p2 = scmp.lt.s32.totalorder %s119_s29, %s119_s29 }
 0x195   :  { %110 = vst.msk [vmem:[#allocation7] sm:$0x3] %vm70_vm2, %v109_v53  ;;  %p221_p1 = scmp.ne.s32.totalorder %s119_s29, %s220_s6  ;;  %p226_p3 = scmp.lt.s32.totalorder %s220_s6, %s220_s6 }
 0x197   :  { %p227_p4 = por %p226_p3, %p225_p2 }
 0x199   :  { %p228_p5 = pnand %p227_p4, %p221_p1 }
 0x19b   :  { %231 = shalt.err (!%p228_p5)
}
 0x19c   :  { %121 = dma.vmem_to_hbm [thread:$0]  %s119_s29, 32, %s306_s3, [#allocation4]  }
 0x19d   :  { %244 = dma.done.wait [#allocation4], 32  }
 0x19e   :  { %245 = vsyncadd [#allocation4], 4294967264 }
 0x19f   :  { %246 = dma.done.wait [#allocation9], 32  }
 0x1a0   :  { %247 = vsyncadd [#allocation9], 4294967264 }
 0x1a1   :  { %138 = vsyncpa [#allocation3], 1 }
 0x1a2   :  { %139 = vsyncpa [#allocation6], 1 }
 0x1a3   :  { %140 = vsyncpa [#allocation4], 1 }
 0x1a4   :  { %141 = vsyncpa [#allocation9], 1 }

</bundles_post_ra>
